<compile_context>
chip_gen: v6e
topology: v6e:2x2x1
jax: 0.10.0
libtpu: 0.0.40
codegen_flags: <defaults>
</compile_context>

<pallas_src>
import functools

import jax
import jax.numpy as jnp
from jax.experimental import pallas as pl
from jax.experimental.pallas import tpu as pltpu


LOGSTD_MIN = -20.0
LOGSTD_MAX = 2.0


def _round_up(x, m):
    return (x + m - 1) // m * m


# ----------------------------------------------------------------------------
# Kernel
# ----------------------------------------------------------------------------
def _policy_kernel(x_ref, w_ref, b_ref, out_ref, *, n_in, n_in_pad, c, c_out):
    """Fused 3-matmul policy forward for one batch tile.

    x_ref  : (B_TILE, n_in)            f32    raw input rows (unpadded)
    w_ref  : (n_in_pad + 2*c, cw)      bf16   rows = [ W1 | W2 | W_heads ]
    b_ref  : (5, cw)                   f32    rows = [ b1 ; b2 ; b_heads ; lo ; hi ]
    out_ref: (B_TILE, c_out)           bf16   cols = [ mean | log_std | 0-pad ]
    """
    # Cast + lane-pad x on-chip (VPU); padded lanes hit zero weight rows.
    xb = x_ref[...].astype(jnp.bfloat16)
    if n_in_pad > n_in:
        pad = jnp.zeros((xb.shape[0], n_in_pad - n_in), jnp.bfloat16)
        xb = jnp.concatenate([xb, pad], axis=1)

    # Static, 128-aligned views into the packed weight slab (no copies).
    w1 = w_ref[0:n_in_pad, 0:c]                          # (n_in_pad, c)
    w2 = w_ref[n_in_pad:n_in_pad + c, 0:c]               # (c, c)
    wh = w_ref[n_in_pad + c:n_in_pad + 2 * c, 0:c_out]   # (c, c_out) fused heads

    # Hidden layer 1 (bf16 MXU, f32 accumulate) + bias + ReLU in f32.
    h = jnp.dot(xb, w1, preferred_element_type=jnp.float32) + b_ref[0:1, 0:c]
    h = jnp.maximum(h, 0.0).astype(jnp.bfloat16)

    # Hidden layer 2.
    h = jnp.dot(h, w2, preferred_element_type=jnp.float32) + b_ref[1:2, 0:c]
    h = jnp.maximum(h, 0.0).astype(jnp.bfloat16)

    # Fused heads: cols [0, n_out) = mean, [n_out, 2*n_out) = log_std.
    heads = (jnp.dot(h, wh, preferred_element_type=jnp.float32)
             + b_ref[2:3, 0:c_out])

    # Per-column clamp via packed bounds rows: mean cols get (-inf, +inf)
    # (pass-through), log_std cols get (-20, 2).
    heads = jnp.minimum(jnp.maximum(heads, b_ref[3:4, 0:c_out]),
                        b_ref[4:5, 0:c_out])
    out_ref[...] = heads.astype(out_ref.dtype)


# ----------------------------------------------------------------------------
# Parameter packing (done once, outside the kernel call path)
# ----------------------------------------------------------------------------
def pack_params(params, n_in, n_out, hidden):
    """Pack 8 parameter arrays into one bf16 weight slab + one f32 bias slab."""
    c = _round_up(hidden, 128)            # hidden lane width
    c_out = _round_up(2 * n_out, 128)     # fused-head / output lane width
    cw = max(c, c_out)                    # slab lane width
    n_in_pad = _round_up(n_in, 128)       # 128-aligned W1 block -> aligned slices

    w_slab = jnp.zeros((n_in_pad + 2 * c, cw), jnp.float32)
    w_slab = w_slab.at[0:n_in, 0:hidden].set(params["w1"])
    w_slab = w_slab.at[n_in_pad:n_in_pad + hidden, 0:hidden].set(params["w2"])
    row_h = n_in_pad + c
    w_slab = w_slab.at[row_h:row_h + hidden, 0:n_out].set(params["wm"])
    w_slab = w_slab.at[row_h:row_h + hidden, n_out:2 * n_out].set(params["ws"])

    b_slab = jnp.zeros((5, cw), jnp.float32)
    b_slab = b_slab.at[0, 0:hidden].set(params["b1"][0])
    b_slab = b_slab.at[1, 0:hidden].set(params["b2"][0])
    b_slab = b_slab.at[2, 0:n_out].set(params["bm"][0])
    b_slab = b_slab.at[2, n_out:2 * n_out].set(params["bs"][0])
    # Rows 3/4: per-column clamp bounds for the fused head output.
    lo = jnp.full((cw,), -jnp.inf, jnp.float32).at[n_out:2 * n_out].set(LOGSTD_MIN)
    hi = jnp.full((cw,), jnp.inf, jnp.float32).at[n_out:2 * n_out].set(LOGSTD_MAX)
    b_slab = b_slab.at[3].set(lo)
    b_slab = b_slab.at[4].set(hi)

    return {
        "w_slab": w_slab.astype(jnp.bfloat16),
        "b_slab": b_slab,
        "dims": (n_in, n_out, hidden, n_in_pad, c, c_out),
    }


# ----------------------------------------------------------------------------
# Wrapper
# ----------------------------------------------------------------------------
def policy_forward(x, packed, *, b_tile=2048):
    """Fused PolicyNN forward.

    x      : [batch, n_in] f32 (raw; no wrapper-side padding/casting)
    packed : output of pack_params
    returns: (mean [batch, n_out], log_std [batch, n_out]), f32
    """
    n_in, n_out, hidden, n_in_pad, c, c_out = packed["dims"]
    batch = x.shape[0]
    assert x.shape[1] == n_in

    # Batch tile: multiple of 8 sublanes, never larger than the batch.
    b_tile = max(8, _round_up(int(b_tile), 8))
    b_tile = min(b_tile, _round_up(batch, 8))
    # v7x megacore: once the batch is big enough, guarantee >=2 grid steps so
    # the "parallel" axis actually shards across both TensorCores.
    if batch >= 2048:
        b_tile = min(b_tile, max(1024, _round_up(pl.cdiv(batch, 2), 8)))
    grid = pl.cdiv(batch, b_tile)   # ragged last block handled by Pallas masking

    rows_w = n_in_pad + 2 * c
    cw = packed["w_slab"].shape[1]

    kernel = functools.partial(
        _policy_kernel, n_in=n_in, n_in_pad=n_in_pad, c=c, c_out=c_out)

    out = pl.pallas_call(
        kernel,
        # bf16, lane-dense [batch, c_out] slab: halves writeback vs f32 and
        # only carries round_up(2*n_out, 128) columns.
        out_shape=jax.ShapeDtypeStruct((batch, c_out), jnp.bfloat16),
        grid=(grid,),
        in_specs=[
            # x: tiled along the batch axis, full (unpadded) feature width.
            pl.BlockSpec((b_tile, n_in), lambda i: (i, 0)),
            # weight slab: constant block index -> VMEM-resident across grid.
            pl.BlockSpec((rows_w, cw), lambda i: (0, 0)),
            # bias + clamp-bounds slab: resident.
            pl.BlockSpec((5, cw), lambda i: (0, 0)),
        ],
        out_specs=pl.BlockSpec((b_tile, c_out), lambda i: (i, 0)),
        compiler_params=pltpu.CompilerParams(
            dimension_semantics=("parallel",),
            vmem_limit_bytes=48 * 1024 * 1024,
        ),
    )(x, packed["w_slab"], packed["b_slab"])

    mean = out[:, :n_out].astype(jnp.float32)
    log_std = out[:, n_out:2 * n_out].astype(jnp.float32)
    return mean, log_std


# ----------------------------------------------------------------------------
# Init (mirrors PyTorch defaults) + references
# ----------------------------------------------------------------------------
def init_params(key, n_in, n_out, hidden):
    """Linear layers: U(-1/sqrt(fan_in), 1/sqrt(fan_in)); heads: U(-0.003, 0.003).
    Weights stored as [in_features, out_features]."""
    ks = jax.random.split(key, 8)

    def uni(k, shape, bound):
        return jax.random.uniform(k, shape, jnp.float32, -bound, bound)

    b1_bound = 1.0 / jnp.sqrt(n_in)
    b2_bound = 1.0 / jnp.sqrt(hidden)
    head_bound = 0.003

    return {
        "w1": uni(ks[0], (n_in, hidden), b1_bound),
        "b1": uni(ks[1], (1, hidden), b1_bound),
        "w2": uni(ks[2], (hidden, hidden), b2_bound),
        "b2": uni(ks[3], (1, hidden), b2_bound),
        "wm": uni(ks[4], (hidden, n_out), head_bound),
        "bm": uni(ks[5], (1, n_out), head_bound),
        "ws": uni(ks[6], (hidden, n_out), head_bound),
        "bs": uni(ks[7], (1, n_out), head_bound),
    }


def _reference_forward_f32(x, p):
    h = jnp.maximum(x @ p["w1"] + p["b1"], 0.0)
    h = jnp.maximum(h @ p["w2"] + p["b2"], 0.0)
    mean = h @ p["wm"] + p["bm"]
    log_std = jnp.clip(h @ p["ws"] + p["bs"], LOGSTD_MIN, LOGSTD_MAX)
    return mean, log_std


def _reference_forward_bf16(x, p):
    """Mirrors the kernel's numerics: bf16 matmul operands, f32 accumulate."""
    bf = jnp.bfloat16
    h = jnp.dot(x.astype(bf), p["w1"].astype(bf),
                preferred_element_type=jnp.float32) + p["b1"]
    h = jnp.maximum(h, 0.0).astype(bf)
    h = jnp.dot(h, p["w2"].astype(bf),
                preferred_element_type=jnp.float32) + p["b2"]
    h = jnp.maximum(h, 0.0).astype(bf)
    mean = jnp.dot(h, p["wm"].astype(bf),
                   preferred_element_type=jnp.float32) + p["bm"]
    ls = jnp.dot(h, p["ws"].astype(bf),
                 preferred_element_type=jnp.float32) + p["bs"]
    return mean, jnp.clip(ls, LOGSTD_MIN, LOGSTD_MAX)


if __name__ == "__main__":
    # Small MuJoCo-like shapes: obs dim 16, action dim 8, hidden 32, batch 32.
    batch, n_in, n_out, hidden = 32, 16, 8, 32

    key = jax.random.PRNGKey(0)
    k_x, k_p = jax.random.split(key)

    x = jax.random.normal(k_x, (batch, n_in), dtype=jnp.float32)
    params = init_params(k_p, n_in, n_out, hidden)
    packed = pack_params(params, n_in, n_out, hidden)

    # Small b_tile here so the batch grid (4 steps) is actually exercised;
    # production batches use the default b_tile=2048 (sweep 2048-4096).
    mean, log_std = policy_forward(x, packed, b_tile=8)
    # Default path (single tile clamped to the batch).
    mean_d, log_std_d = policy_forward(x, packed)
    jax.block_until_ready((mean, log_std, mean_d, log_std_d))

    assert mean.shape == (batch, n_out) and log_std.shape == (batch, n_out)

    # Tiling must not change the math (same per-row computation).
    assert jnp.allclose(mean, mean_d, atol=1e-5, rtol=1e-5)
    assert jnp.allclose(log_std, log_std_d, atol=1e-5, rtol=1e-5)

    # Check against a reference with identical bf16-matmul numerics
    # (kernel additionally rounds the output slab to bf16).
    ref_mean_bf, ref_ls_bf = _reference_forward_bf16(x, params)
    assert jnp.allclose(mean, ref_mean_bf, atol=2e-3, rtol=2e-2)
    assert jnp.allclose(log_std, ref_ls_bf, atol=2e-3, rtol=2e-2)

    # Loose check against the full-f32 reference (bf16 rounding tolerance).
    ref_mean, ref_ls = _reference_forward_f32(x, params)
    assert jnp.allclose(mean, ref_mean, atol=2e-2, rtol=2e-2)
    assert jnp.allclose(log_std, ref_ls, atol=2e-2, rtol=2e-2)

    print("KERNEL_OK")
</pallas_src>

<mosaic_0001>
module attributes {stable_mosaic.version = 11 : i64} {
  func.func @_policy_kernel(%arg0: i32, %arg1: memref<8x16xf32, #tpu.memory_space<vmem>>, %arg2: memref<384x128xbf16, #tpu.memory_space<vmem>>, %arg3: memref<5x128xf32, #tpu.memory_space<vmem>>, %arg4: memref<8x128xbf16, #tpu.memory_space<vmem>>) attributes {dimension_semantics = [#tpu.dimension_semantics<parallel>], iteration_bounds = array<i64: 4>, scalar_prefetch = 0 : i64, scratch_operands = 0 : i64, tpu.core_type = #tpu.core_type<tc>, window_params = [{transform_indices = @transform_0, window_bounds = array<i64: 8, 16>}, {pipeline_mode = #tpu.pipeline_mode<synchronous>, transform_indices = @transform_1, window_bounds = array<i64: 384, 128>}, {pipeline_mode = #tpu.pipeline_mode<synchronous>, transform_indices = @transform_2, window_bounds = array<i64: 5, 128>}, {transform_indices = @transform_3, window_bounds = array<i64: 8, 128>}]} {
    %c0 = arith.constant 0 : index
    %c0_0 = arith.constant 0 : index
    %0 = vector.load %arg1[%c0, %c0_0] : memref<8x16xf32, #tpu.memory_space<vmem>>, vector<8x16xf32>
    %1 = arith.truncf %0 : vector<8x16xf32> to vector<8x16xbf16>
    %cst = arith.constant 0.000000e+00 : bf16
    %2 = vector.broadcast %cst : bf16 to vector<8x112xbf16>
    %3 = tpu.concatenate %1, %2 in 1 : vector<8x16xbf16>, vector<8x112xbf16> -> vector<8x128xbf16>
    %c0_1 = arith.constant 0 : index
    %c0_2 = arith.constant 0 : index
    %4 = vector.load %arg2[%c0_1, %c0_2] : memref<384x128xbf16, #tpu.memory_space<vmem>>, vector<128x128xbf16>
    %c128 = arith.constant 128 : index
    %c0_3 = arith.constant 0 : index
    %5 = vector.load %arg2[%c128, %c0_3] : memref<384x128xbf16, #tpu.memory_space<vmem>>, vector<128x128xbf16>
    %c256 = arith.constant 256 : index
    %c0_4 = arith.constant 0 : index
    %6 = vector.load %arg2[%c256, %c0_4] : memref<384x128xbf16, #tpu.memory_space<vmem>>, vector<128x128xbf16>
    %cst_5 = arith.constant dense<0.000000e+00> : vector<8x128xf32>
    %7 = tpu.matmul %3, %4, %cst_5 {dimension_numbers = #tpu.dot_dimension_numbers<[1], [0], [0], [1], [0, 0, 1, 1], [], []>} : vector<8x128xbf16>, vector<128x128xbf16>, vector<8x128xf32> -> vector<8x128xf32>
    %c0_6 = arith.constant 0 : index
    %c0_7 = arith.constant 0 : index
    %8 = vector.load %arg3[%c0_6, %c0_7] : memref<5x128xf32, #tpu.memory_space<vmem>>, vector<1x128xf32>
    %9 = vector.broadcast %8 : vector<1x128xf32> to vector<8x128xf32>
    %10 = arith.addf %7, %9 : vector<8x128xf32>
    %cst_8 = arith.constant 0.000000e+00 : f32
    %11 = vector.broadcast %cst_8 : f32 to vector<8x128xf32>
    %12 = arith.maximumf %10, %11 : vector<8x128xf32>
    %13 = arith.truncf %12 : vector<8x128xf32> to vector<8x128xbf16>
    %cst_9 = arith.constant dense<0.000000e+00> : vector<8x128xf32>
    %14 = tpu.matmul %13, %5, %cst_9 {dimension_numbers = #tpu.dot_dimension_numbers<[1], [0], [0], [1], [0, 0, 1, 1], [], []>} : vector<8x128xbf16>, vector<128x128xbf16>, vector<8x128xf32> -> vector<8x128xf32>
    %c1 = arith.constant 1 : index
    %c0_10 = arith.constant 0 : index
    %15 = vector.load %arg3[%c1, %c0_10] : memref<5x128xf32, #tpu.memory_space<vmem>>, vector<1x128xf32>
    %16 = vector.broadcast %15 : vector<1x128xf32> to vector<8x128xf32>
    %17 = arith.addf %14, %16 : vector<8x128xf32>
    %cst_11 = arith.constant 0.000000e+00 : f32
    %18 = vector.broadcast %cst_11 : f32 to vector<8x128xf32>
    %19 = arith.maximumf %17, %18 : vector<8x128xf32>
    %20 = arith.truncf %19 : vector<8x128xf32> to vector<8x128xbf16>
    %cst_12 = arith.constant dense<0.000000e+00> : vector<8x128xf32>
    %21 = tpu.matmul %20, %6, %cst_12 {dimension_numbers = #tpu.dot_dimension_numbers<[1], [0], [0], [1], [0, 0, 1, 1], [], []>} : vector<8x128xbf16>, vector<128x128xbf16>, vector<8x128xf32> -> vector<8x128xf32>
    %c2 = arith.constant 2 : index
    %c0_13 = arith.constant 0 : index
    %22 = vector.load %arg3[%c2, %c0_13] : memref<5x128xf32, #tpu.memory_space<vmem>>, vector<1x128xf32>
    %23 = vector.broadcast %22 : vector<1x128xf32> to vector<8x128xf32>
    %24 = arith.addf %21, %23 : vector<8x128xf32>
    %c3 = arith.constant 3 : index
    %c0_14 = arith.constant 0 : index
    %25 = vector.load %arg3[%c3, %c0_14] : memref<5x128xf32, #tpu.memory_space<vmem>>, vector<1x128xf32>
    %26 = vector.broadcast %25 : vector<1x128xf32> to vector<8x128xf32>
    %27 = arith.maximumf %24, %26 : vector<8x128xf32>
    %c4 = arith.constant 4 : index
    %c0_15 = arith.constant 0 : index
    %28 = vector.load %arg3[%c4, %c0_15] : memref<5x128xf32, #tpu.memory_space<vmem>>, vector<1x128xf32>
    %29 = vector.broadcast %28 : vector<1x128xf32> to vector<8x128xf32>
    %30 = arith.minimumf %27, %29 : vector<8x128xf32>
    %31 = arith.truncf %30 : vector<8x128xf32> to vector<8x128xbf16>
    %c0_16 = arith.constant 0 : index
    %c0_17 = arith.constant 0 : index
    %32 = vector.load %arg4[%c0_16, %c0_17] : memref<8x128xbf16, #tpu.memory_space<vmem>>, vector<8x128xbf16>
    tpu.vector_store %arg4[%c0_16, %c0_17], %31 {strides = array<i32>} : memref<8x128xbf16, #tpu.memory_space<vmem>>, vector<8x128xbf16>,
    return
  }
  func.func @transform_0(%arg0: i32) -> (i32, i32) {
    %c0_i32 = arith.constant 0 : i32
    %c0_i32_0 = arith.constant 0 : i32
    return %arg0, %c0_i32 : i32, i32
  }
  func.func @transform_1(%arg0: i32) -> (i32, i32) {
    %c0_i32 = arith.constant 0 : i32
    %c0_i32_0 = arith.constant 0 : i32
    %c0_i32_1 = arith.constant 0 : i32
    return %c0_i32, %c0_i32_0 : i32, i32
  }
  func.func @transform_2(%arg0: i32) -> (i32, i32) {
    %c0_i32 = arith.constant 0 : i32
    %c0_i32_0 = arith.constant 0 : i32
    %c0_i32_1 = arith.constant 0 : i32
    return %c0_i32, %c0_i32_0 : i32, i32
  }
  func.func @transform_3(%arg0: i32) -> (i32, i32) {
    %c0_i32 = arith.constant 0 : i32
    %c0_i32_0 = arith.constant 0 : i32
    return %arg0, %c0_i32 : i32, i32
  }
}

</mosaic_0001>

<bundles_post_ra>
// kernel: tpu_custom_call.1
= control target key start
LH: loop header
LB: loop body
LE: loop exit
PB: predicated region body
PF: predicated region fallthrough
CT: control target
= control target key end

     0   :  { %8 = vsyncpa [#allocation3], 0  ;;  %s1094_s0 = inlined_call_operand.vmem [shape: f32[32,16], index: 0, kind: input, shape index: {}]   ;;  %s1095_s1 = inlined_call_operand.hbm [shape: bf16[384,128], index: 1, kind: input, shape index: {}]   ;;  %s1096_s2 = inlined_call_operand.vmem [shape: f32[5,128], index: 2, kind: input, shape index: {}]   ;;  %s1097_s3 = inlined_call_operand.hbm [shape: bf16[32,128], index: 3, kind: output, shape index: {}]  }
   0x1   :  { %9 = vsyncpa [#allocation4], 0 }
   0x2   :  { %11 = vsyncpa [#allocation4 + $0x1], 0  ;;  %s944_s12 = smov 0   ;;  %s946_s13 = smov 0  }
   0x3   :  { %s948_s14 = smov 0   ;;  %s950_s15 = smov 0  }
   0x4 LB: > { %s965_s16 = sadd.s32 4294967295, %s916_s15   ;;  %s619_s17 = sadd.s32 4294967294, %s916_s15   ;;  %s916_s15 = sphi %s950_s15, %s1105_s15   ;;  %s912_s14 = sphi %s948_s14, %s1104_s14   ;;  %s908_s13 = sphi %s946_s13, %s1103_s13   ;;  %s904_s12 = sphi %s944_s12, %s1102_s12  }
   0x5   : > { %s969_s18 = sadd.s32 1, %s916_s15   ;;  %s92_s19 = sadd.s32 1, %s912_s14 }
   0x6   : > { %s89_s20 = ssub.s32 %s916_s15, %s969_s18  ;;  %p102_p0 = scmp.ne.s32.totalorder %s912_s14, %s908_s13 }
   0x7   : > { %p90_p1 = scmp.eq.s32.totalorder %s89_s20, 0  ;;  %p103_p2 = scmp.eq.s32.totalorder %s965_s16, 3 }
   0x8   : > { %p108_p3 = scmp.ne.s32.totalorder %s908_s13, %s904_s12  ;;  %p109_p4 = scmp.eq.s32.totalorder %s619_s17, 3 }
   0x9   : > { %s980_s21 = scalar_select %p90_p1, %s912_s14, %s92_s19  }
   0xa   : > { %p982_p5 = por %p103_p2, %p102_p0  ;;  %p986_p6 = por %p109_p4, %p108_p3 }
   0xb   : > { %p620_p7 = scmp.ge.s32.totalorder %s916_s15, 1  ;;  %p116_p8 = scmp.lt.s32.totalorder %s916_s15, 5 }
   0xc   : > { %s1099_s23 = scalar_select %p986_p6, 1, 0 }
   0xd   : > { %p762_p9 = scmp.eq.s32.totalorder %s965_s16, 0  ;;  %p993_p10 = pnand %p620_p7, %p116_p8 }
   0xe   : > { %s918_s25 = smov [#allocation2]  }
   0xf   : > { %s128_s26 = sshll.u32 %s918_s25, 4  ;;  %p754_p11 = pneg %p993_p10  ;;  %s129_s26 = int_to_ptr.vmem [resolvable:$true] %s128_s26 }
  0x10   : > { %s837_s27 = scalar_lea.vmem %s129_s26, 3072  ;;  %p845_p3 = scmp.lt.s32.totalorder %s129_s26, %s129_s26 }
  0x11   : > { %p755_p12 = pnand %p762_p9, %p754_p11  ;;  %p838_p0 = scmp.ne.s32.totalorder %s129_s26, %s837_s27 }
  0x12   : > { %p846_p4 = scmp.lt.s32.totalorder %s837_s27, %s837_s27 }
  0x13   : > { %p828_p13 = pneg %p755_p12 }
  0x14   : > { %p847_p6 = por %p846_p4, %p845_p3 }
  0x15   : > { %p840_p1 = pnand %p838_p0, %p828_p13 }
  0x17   : > { %p841_p2 = pneg %p840_p1 }
  0x19   : > { %p848_p7 = pnand %p847_p6, %p841_p2 }
  0x1b   : > { %851 = shalt.err (!%p848_p7)
}
  0x1c   : > { %s919_s28 = smov 64   ;;  %s920_s29 = smov 4  }
  0x1d   : > { %757 = dma.hbm_to_vmem [thread:$0]  (!%p755_p12), %s1095_s1, 3072, %s129_s26, [#allocation3], %s919_s28, %s919_s28, %s920_s29  }
  0x1e   : > { %154 = sbr.rel (%p993_p10) target bundleno = 682 (0x2aa), region = 32 }
  0x23   : > { %895 = dma.done.wait (%p762_p9), [#allocation3], 3072  }
  0x24   : > { %897 = vsyncadd (%p762_p9), [#allocation3], 4294964224  ;;  %v921_v0 = vmov 0.0   ;;  %vm922_vm0 = vmmov 0   ;;  %v802_v1 = vld [vmem:[#allocation2 + $0x38] sm:$0xff]   ;;  %v803_v2 = vld [vmem:[#allocation2 + $0x30] sm:$0xff]  }
  0x25   : > { %688 = vmatprep.subr.bf16.mxu0 %v921_v0  ;;  %704 = vmatprep.mubr.msk.bf16.mxu0 %vm922_vm0, %v921_v0  ;;  %v804_v3 = vld [vmem:[#allocation2 + $0x28] sm:$0xff]   ;;  %p177_p6 = scmp.lt.s32.totalorder %s965_s16, 3  ;;  %v810_v4 = vld [vmem:[#allocation2 + $0x78] sm:$0xff]   ;;  %v805_v5 = vld [vmem:[#allocation2 + $0x20] sm:$0xff]   ;;  %vm184_vm1 = vcmask 130048   ;;  %s174_s20 = sand.u32 1, %s908_s13  }
  0x26   : > { %708 = vmatprep.subr.bf16.mxu1 %v921_v0  ;;  %724 = vmatprep.mubr.msk.bf16.mxu1 %vm922_vm0, %v921_v0  ;;  %v811_v6 = vld [vmem:[#allocation2 + $0x70] sm:$0xff]   ;;  %v806_v7 = vld [vmem:[#allocation2 + $0x18] sm:$0xff]   ;;  %v812_v8 = vld [vmem:[#allocation2 + $0x68] sm:$0xff]   ;;  %s625_s26 = sshll.u32 %s174_s20, 2  ;;  %s658_s4 = sshll.u32 %s965_s16, 6 }
  0x27   : > { %689 = vmatpush3.bf16.msra.mxu0 %v802_v1  ;;  %s178_s5 = scalar_select %p177_p6, %s965_s16, 3  ;;  %709 = vmatpush3.bf16.msra.mxu1 %v810_v4  ;;  %v807_v9 = vld [vmem:[#allocation2 + $0x10] sm:$0xff]   ;;  %v813_v10 = vld [vmem:[#allocation2 + $0x60] sm:$0xff]   ;;  %v808_v11 = vld [vmem:[#allocation2 + $0x8] sm:$0xff]  }
  0x28   : > { %690 = vmatprep.subr.bf16.mxu0 %v921_v0  ;;  %710 = vmatprep.subr.bf16.mxu1 %v921_v0  ;;  %v814_v12 = vld [vmem:[#allocation2 + $0x58] sm:$0xff]   ;;  %v809_v13 = vld [vmem:[#allocation2] sm:$0xff]   ;;  %v815_v15 = vld [vmem:[#allocation2 + $0x50] sm:$0xff]   ;;  %s535_s10 = scalar_lea.sflag [#allocation4], %s174_s20  ;;  %s923_s17 = smov [#allocation5]  }
  0x29   : > { %s626_s6 = sshll.u32 %s178_s5, 3  ;;  %v816_v17 = vld [vmem:[#allocation2 + $0x48] sm:$0xff]   ;;  %v817_v18 = vld [vmem:[#allocation2 + $0x40] sm:$0xff]   ;;  %v818_v19 = vld [vmem:[#allocation2 + $0xb8] sm:$0xff]   ;;  %s176_s5 = scalar_lea.vmem [#allocation5], %s625_s26 }
  0x2a   : > { %s180_s9 = scalar_lea.vmem %s1094_s0, %s626_s6  ;;  %v819_v20 = vld [vmem:[#allocation2 + $0xb0] sm:$0xff]   ;;  %v820_v21 = vld [vmem:[#allocation2 + $0xa8] sm:$0xff]   ;;  %v821_v22 = vld [vmem:[#allocation2 + $0xa0] sm:$0xff]   ;;  %s548_s6 = sshll.u32 %s176_s5, 4  ;;  %s549_s6 = int_to_ptr.vmem [resolvable:$true] %s548_s6 }
  0x2b   : > { %691 = vmatpush3.bf16.msra.mxu0 %v803_v2  ;;  %711 = vmatpush3.bf16.msra.mxu1 %v811_v6  ;;  %v182_v14 = vld [vmem:[%s180_s9] sm:$0xff]  ;;  %v822_v23 = vld [vmem:[#allocation2 + $0x98] sm:$0xff]   ;;  %v823_v24 = vld [vmem:[#allocation2 + $0x90] sm:$0xff]   ;;  %s546_s9 = scalar_lea.hbm %s1097_s3, %s658_s4  ;;  %s852_s11 = scalar_lea.vmem %s549_s6, 64 }
  0x2c   : > { %692 = vmatprep.subr.bf16.mxu0 %v921_v0  ;;  %712 = vmatprep.subr.bf16.mxu1 %v921_v0  ;;  %v183_v16 = vpack.c.bf16 %v182_v14, %v182_v14  ;;  %v627_v25 = vld [vmem:[%s1096_s2] ss:$0 sm:$0xff]  ;;  %v824_v33 = vld [vmem:[#allocation2 + $0x88] sm:$0xff]   ;;  %v637_v35 = vld [vmem:[%s1096_s2 + $0x1] ss:$0 sm:$0xff]  ;;  %p853_p8 = scmp.ne.s32.totalorder %s549_s6, %s852_s11  ;;  %s856_s19 = sshll.u32 %s923_s17, 4  ;;  %s857_s19 = int_to_ptr.vmem [resolvable:$false] %s856_s19 }
  0x2d   : > { %v825_v34 = vld [vmem:[#allocation2 + $0x80] sm:$0xff]   ;;  %s858_s16 = scalar_lea.vmem %s857_s19, 128  ;;  %p859_p11 = scmp.lt.s32.totalorder %s549_s6, %s857_s19 }
  0x2e   : > { %v646_v43 = vld [vmem:[%s1096_s2 + $0x2] ss:$0 sm:$0xff]  ;;  %v655_v45 = vld [vmem:[%s1096_s2 + $0x3] ss:$0 sm:$0xff]  ;;  %v656_v47 = vld [vmem:[%s1096_s2 + $0x4] ss:$0 sm:$0xff]  ;;  %p854_p9 = pnand %p853_p8, %p982_p5  ;;  %p860_p12 = scmp.lt.s32.totalorder %s858_s16, %s852_s11 }
  0x2f   : > { %693 = vmatpush3.bf16.msra.mxu0 %v804_v3  ;;  %713 = vmatpush3.bf16.msra.mxu1 %v812_v8 }
  0x30   : > { %694 = vmatprep.subr.bf16.mxu0 %v921_v0  ;;  %714 = vmatprep.subr.bf16.mxu1 %v921_v0  ;;  %p855_p10 = pneg %p854_p9  ;;  %p861_p13 = por %p860_p12, %p859_p11 }
  0x32   : > { %p862_p0 = pnand %p861_p13, %p855_p10 }
  0x33   : > { %695 = vmatpush3.bf16.msra.mxu0 %v805_v5  ;;  %715 = vmatpush3.bf16.msra.mxu1 %v813_v10 }
  0x34   : > { %696 = vmatprep.subr.bf16.mxu0 %v921_v0  ;;  %716 = vmatprep.subr.bf16.mxu1 %v921_v0 }
  0x37   : > { %697 = vmatpush3.bf16.msra.mxu0 %v806_v7  ;;  %717 = vmatpush3.bf16.msra.mxu1 %v814_v12 }
  0x38   : > { %698 = vmatprep.subr.bf16.mxu0 %v921_v0  ;;  %718 = vmatprep.subr.bf16.mxu1 %v921_v0 }
  0x3b   : > { %699 = vmatpush3.bf16.msra.mxu0 %v807_v9  ;;  %719 = vmatpush3.bf16.msra.mxu1 %v815_v15 }
  0x3c   : > { %700 = vmatprep.subr.bf16.mxu0 %v921_v0  ;;  %720 = vmatprep.subr.bf16.mxu1 %v921_v0 }
  0x3f   : > { %701 = vmatpush3.bf16.msra.mxu0 %v808_v11  ;;  %721 = vmatpush3.bf16.msra.mxu1 %v816_v17 }
  0x40   : > { %702 = vmatprep.subr.bf16.mxu0 %v921_v0  ;;  %722 = vmatprep.subr.bf16.mxu1 %v921_v0 }
  0x43   : > { %703 = vmatpush3.bf16.msra.mxu0 %v809_v13  ;;  %723 = vmatpush3.bf16.msra.mxu1 %v817_v18 }
  0x44   : > { %728 = vmatprep.subr.bf16.mxu0 %v921_v0 }
  0x46   : > { %705 = vmatmul.mubr.msk.bf16.vlgmr.msra.gmra.mxu0 %vm184_vm1, %v183_v16 }
  0x47   : > { %744 = vmatprep.mubr.msk.bf16.mxu0 %vm922_vm0, %v921_v0  ;;  %729 = vmatpush3.bf16.msra.mxu0 %v818_v19 }
  0x48   : > { %730 = vmatprep.subr.bf16.mxu0 %v921_v0 }
  0x4b   : > { %731 = vmatpush3.bf16.msra.mxu0 %v819_v20 }
  0x4c   : > { %732 = vmatprep.subr.bf16.mxu0 %v921_v0 }
  0x4f   : > { %733 = vmatpush3.bf16.msra.mxu0 %v820_v21 }
  0x50   : > { %734 = vmatprep.subr.bf16.mxu0 %v921_v0 }
  0x53   : > { %735 = vmatpush3.bf16.msra.mxu0 %v821_v22 }
  0x54   : > { %736 = vmatprep.subr.bf16.mxu0 %v921_v0 }
  0x57   : > { %737 = vmatpush3.bf16.msra.mxu0 %v822_v23 }
  0x58   : > { %738 = vmatprep.subr.bf16.mxu0 %v921_v0 }
  0x5b   : > { %739 = vmatpush3.bf16.msra.mxu0 %v823_v24 }
  0x5c   : > { %740 = vmatprep.subr.bf16.mxu0 %v921_v0 }
  0x5f   : > { %741 = vmatpush3.bf16.msra.mxu0 %v824_v33 }
  0x60   : > { %742 = vmatprep.subr.bf16.mxu0 %v921_v0 }
  0x63   : > { %743 = vmatpush3.bf16.msra.mxu0 %v825_v34 }
 0x106   : > { %v324_v26 = vpop.f32.mrf.mxu0 }
 0x107   : > { %v325_v27 = vadd.f32 %v627_v25, %v324_v26 }
 0x108   : > { %v706_v28 = vpop.f32.mrf.mxu0 }
 0x109   : > { %v330_v29 = vmax.f32 %v325_v27, 0.0 }
 0x10a   : > { %v327_v30 = vpop.f32.mrf.mxu0 }
 0x10b   : > { %v331_v31 = vpack.c.bf16 %v330_v29, %v330_v29 }
 0x10c   : > { %v707_v32 = vpop.f32.mrf.mxu0 }
 0x10d   : > { %725 = vmatmul.mubr.bf16.vlgmr.msra.gmra.mxu1 %v331_v31 }
 0x1cd   : > { %v419_v36 = vpop.f32.mrf.mxu1 }
 0x1ce   : > { %v420_v37 = vadd.f32 %v637_v35, %v419_v36 }
 0x1cf   : > { %v726_v38 = vpop.f32.mrf.mxu1 }
 0x1d0   : > { %v425_v39 = vmax.f32 %v420_v37, 0.0 }
 0x1d1   : > { %v422_v40 = vpop.f32.mrf.mxu1 }
 0x1d2   : > { %v426_v41 = vpack.c.bf16 %v425_v39, %v425_v39 }
 0x1d3   : > { %v727_v42 = vpop.f32.mrf.mxu1 }
 0x1d4   : > { %745 = vmatmul.mubr.bf16.vlgmr.msra.gmra.mxu0 %v426_v41 }
 0x294   : > { %v514_v44 = vpop.f32.mrf.mxu0 }
 0x295   : > { %v515_v46 = vadd.f32 %v646_v43, %v514_v44 }
 0x296   : > { %v746_v48 = vpop.f32.mrf.mxu0 }
 0x297   : > { %v525_v49 = vmax.f32 %v515_v46, %v655_v45 }
 0x298   : > { %v517_v50 = vpop.f32.mrf.mxu0 }
 0x299   : > { %v531_v51 = vmin.f32 %v525_v49, %v656_v47 }
 0x29a   : > { %v747_v52 = vpop.f32.mrf.mxu0 }
 0x29b   : > { %v532_v53 = vpack.c.bf16 %v531_v51, %v531_v51 }
 0x29d   : > { %533 = vst [vmem:[%s176_s5] sm:$0xf] %v532_v53 }
 0x29e   : > { %865 = shalt.err (!%p862_p0)
}
 0x29f   : > { %s866_s24 = scalar_lea.hbm %s546_s9, 64  ;;  %s870_s26 = scalar_lea.hbm %s1097_s3, 256 }
 0x2a0   : > { %p867_p1 = scmp.ne.s32.totalorder %s546_s9, %s866_s24  ;;  %p871_p4 = scmp.lt.s32.totalorder %s546_s9, %s1097_s3 }
 0x2a1   : > { %p872_p7 = scmp.lt.s32.totalorder %s870_s26, %s866_s24 }
 0x2a2   : > { %p868_p2 = pnand %p867_p1, %p982_p5 }
 0x2a3   : > { %p873_p6 = por %p872_p7, %p871_p4 }
 0x2a4   : > { %p869_p3 = pneg %p868_p2 }
 0x2a6   : > { %p874_p8 = pnand %p873_p6, %p869_p3 }
 0x2a8   : > { %877 = shalt.err (!%p874_p8)
}
 0x2a9   : > { %752 = dma.vmem_to_hbm [thread:$0]  (%p982_p5), %s549_s6, 64, %s546_s9, %s535_s10  }
 0x2aa PF: > { %p764_p9 = scmp.ge.s32.totalorder %s916_s15, 2  ;;  %s560_s29 = sand.u32 1, %s904_s12  }
 0x2ab   : > { %p1101_p10 = scmp.ne.s32.totalorder %s1099_s23, 0  ;;  %s561_s30 = scalar_lea.sflag [#allocation4], %s560_s29 }
 0x2ad   : > { %p759_p11 = pnand %p764_p9, %p1101_p10 }
 0x2af   : > { %p760_p12 = pneg %p759_p11 }
 0x2b1   : > { %899 = dma.done.wait (%p760_p12), %s561_s30, 64  }
 0x2b2   : > { %901 = vsyncadd (%p760_p12), %s561_s30, 4294967232  ;;  %p14_p13 = scmp.ge.s32.totalorder %s969_s18, 6   ;;  %s1102_s12 = smov %s908_s13 }
 0x2b3   : > { %s1103_s13 = smov %s912_s14  ;;  %s1104_s14 = smov %s980_s21 }
 0x2b4   : > { %s1105_s15 = smov %s969_s18  ;;  %16 = sbr.rel (!%p14_p13) target bundleno = 4 (0x4), region = 72 }
 0x2b9   :  { %566 = vsyncpa [#allocation3], 1 }
 0x2ba   :  { %568 = vsyncpa [#allocation3 + $0x1], 1 }
 0x2bb   :  { %569 = vsyncpa [#allocation4], 1 }
 0x2bc   :  { %571 = vsyncpa [#allocation4 + $0x1], 1 }

</bundles_post_ra>
